<compile_context>
chip_gen: v5e
topology: v5e:2x2
jax: 0.10.0
libtpu: 0.0.40
codegen_flags: <defaults>
</compile_context>

<pallas_src>
import functools

import jax
import jax.numpy as jnp
from jax.experimental import pallas as pl
from jax.experimental.pallas import tpu as pltpu

_MiB = 1024 * 1024


# ----------------------------------------------------------------------------
# Hardware-aware sizing helpers
# ----------------------------------------------------------------------------
def _vmem_budget_bytes():
    """Scoped-VMEM budget with headroom for compiler-internal scratch.

    ~48 MiB on v7x (64 MiB physical per TC), ~96 MiB on v5e/v6e (128 MiB).
    Falls back to the conservative v7x number if the query is unavailable.
    """
    try:
        cap = int(pltpu.get_tpu_info().vmem_capacity_bytes)
    except Exception:  # pragma: no cover - unusual/mocked backends
        cap = 64 * _MiB
    if cap <= 0:
        cap = 64 * _MiB
    return max(min((cap * 3) // 4, 96 * _MiB), 32 * _MiB)


def _pick_hw_tile(hw, c, itemsize, target_block_bytes):
    """Largest 128-multiple HW tile whose (C, tile) block fits the target.

    No divisibility requirement on hw: the grids use cdiv and pass 1 masks the
    padded tail of the last tile (pass 2's out-of-bounds stores are dropped).
    """
    tile = (target_block_bytes // max(c * itemsize, 1)) // 128 * 128
    tile = max(tile, 128)
    if tile >= hw:
        return int(hw)  # single full-extent block (always layout-legal)
    return int(tile)


# ----------------------------------------------------------------------------
# Fused single-pass kernel: whole image (C, HW) resident in VMEM.
# Grid: (N,), "parallel".
# ----------------------------------------------------------------------------
def _fused_kernel(x_ref, w1_ref, b1_ref, w2_ref, b2_ref, ws_ref, bs_ref, o_ref,
                  *, inv_hw, sse_on_mxu):
    x = x_ref[0]                                                  # (C, HW)
    # cSE: global average pool -> 1x1 conv -> ReLU -> 1x1 conv -> sigmoid.
    pooled = jnp.sum(x, axis=-1, keepdims=True) * inv_hw          # (C, 1)
    h = jnp.dot(w1_ref[...], pooled,
                preferred_element_type=jnp.float32) + b1_ref[...]  # (hidden, 1)
    h = jnp.maximum(h, 0.0)
    cse = jax.nn.sigmoid(
        jnp.dot(w2_ref[...], h, preferred_element_type=jnp.float32)
        + b2_ref[...])                                            # (C, 1)
    # sSE: 1x1 conv over channels -> sigmoid, lane-dense over HW.
    if sse_on_mxu:
        s = jnp.dot(ws_ref[...], x, preferred_element_type=jnp.float32)  # (1, HW)
    else:
        s = jnp.sum(ws_ref[...] * x, axis=0, keepdims=True)              # (1, HW)
    sse = jax.nn.sigmoid(s + bs_ref[0, 0])
    o_ref[0] = (x * (cse + sse)).astype(o_ref.dtype)


# ----------------------------------------------------------------------------
# Two-pass fallback, pass 1: partitioned partial spatial sums.
# Grid: (N, n_parts, tiles_per_part) = ("parallel", "parallel", "arbitrary").
# ----------------------------------------------------------------------------
def _pooled_sum_kernel(x_ref, psum_ref, *, hw, hw_tile, tiles_per_part):
    p = pl.program_id(1)
    t = pl.program_id(2)

    @pl.when(t == 0)
    def _():
        psum_ref[...] = jnp.zeros_like(psum_ref)

    x = x_ref[0]                                                  # (C, hw_tile)
    base = (p * tiles_per_part + t) * hw_tile
    col = base + jax.lax.broadcasted_iota(jnp.int32, x.shape, 1)
    x = jnp.where(col < hw, x, 0.0)                               # mask padded tail
    psum_ref[0, 0] += jnp.sum(x, axis=-1, keepdims=True)          # (C, 1)


# ----------------------------------------------------------------------------
# Two-pass fallback, pass 2: out = x * (cse + sse).
# Grid: (N, num_hw_tiles), both "parallel".
# ----------------------------------------------------------------------------
def _apply_kernel(x_ref, cse_ref, ws_ref, bs_ref, o_ref, *, sse_on_mxu):
    x = x_ref[0]                                                  # (C, hw_tile)
    if sse_on_mxu:
        s = jnp.dot(ws_ref[...], x, preferred_element_type=jnp.float32)
    else:
        s = jnp.sum(ws_ref[...] * x, axis=0, keepdims=True)
    sse = jax.nn.sigmoid(s + bs_ref[0, 0])                        # (1, hw_tile)
    o_ref[0] = (x * (cse_ref[0] + sse)).astype(o_ref.dtype)


# ----------------------------------------------------------------------------
# Wrapper
# ----------------------------------------------------------------------------
def scse_pallas(x_nchw, w1, b1, w2, b2, ws, bs, *,
                out_dtype=None, hw_tile=None, force_two_pass=False):
    """SCSE forward.

    x_nchw: (N, C, H, W).
    Weights are the squeezed 1x1-conv matrices in PyTorch (out, in) orientation:
      w1: (C//r, C), b1: (C//r, 1), w2: (C, C//r), b2: (C, 1), ws: (1, C), bs: (1, 1).
    out_dtype: optionally narrow the stored output (e.g. jnp.bfloat16); all math stays f32.
    """
    N, C, H, W = x_nchw.shape
    HW = H * W
    hidden = w1.shape[0]
    out_dtype = x_nchw.dtype if out_dtype is None else jnp.dtype(out_dtype)
    itemsize = jnp.dtype(x_nchw.dtype).itemsize

    x = x_nchw.reshape(N, C, HW)          # free reshape: HW on the lane axis

    vmem_budget = _vmem_budget_bytes()
    # Output reuses x's HBM buffer when dtypes match (no extra allocation/copy).
    alias = {0: 0} if out_dtype == x.dtype else {}
    # For small C an M=1 matmul wastes the MXU; use VPU mul + sublane reduce.
    sse_on_mxu = C >= 64
    ws_arg = ws if sse_on_mxu else ws.reshape(C, 1)
    ws_block = (1, C) if sse_on_mxu else (C, 1)
    bs_spec = pl.BlockSpec(memory_space=pltpu.MemorySpace.SMEM)

    # -------- fused single pass: whole-image slab resident in VMEM --------
    # x block + out block, each double-buffered -> ~4 live slabs (+ weights).
    slab_bytes = C * HW * itemsize
    if slab_bytes <= vmem_budget // 6 and not force_two_pass:
        out = pl.pallas_call(
            functools.partial(_fused_kernel, inv_hw=1.0 / float(HW),
                              sse_on_mxu=sse_on_mxu),
            out_shape=jax.ShapeDtypeStruct((N, C, HW), out_dtype),
            grid_spec=pltpu.PrefetchScalarGridSpec(
                num_scalar_prefetch=0,
                grid=(N,),
                in_specs=[
                    pl.BlockSpec((1, C, HW), lambda n: (n, 0, 0)),
                    pl.BlockSpec((hidden, C), lambda n: (0, 0)),
                    pl.BlockSpec((hidden, 1), lambda n: (0, 0)),
                    pl.BlockSpec((C, hidden), lambda n: (0, 0)),
                    pl.BlockSpec((C, 1), lambda n: (0, 0)),
                    pl.BlockSpec(ws_block, lambda n: (0, 0)),
                    bs_spec,
                ],
                out_specs=pl.BlockSpec((1, C, HW), lambda n: (n, 0, 0)),
            ),
            compiler_params=pltpu.CompilerParams(
                dimension_semantics=("parallel",),
                vmem_limit_bytes=vmem_budget),
            input_output_aliases=alias,
        )(x, w1, b1, w2, b2, ws_arg, bs)
        return out.reshape(N, C, H, W)

    # -------- two-pass fallback for large feature maps --------
    if hw_tile is None:
        target_block = 4 * _MiB if vmem_budget >= 64 * _MiB else 2 * _MiB
        hw_tile = _pick_hw_tile(HW, C, itemsize, target_block)
    assert hw_tile == HW or hw_tile % 128 == 0, "hw_tile must be lane-aligned"
    num_hw_tiles = -(-HW // hw_tile)

    # Split the HW reduction into partitions so both v7x TensorCores have work
    # even at N=1 (the per-partition accumulation axis stays "arbitrary").
    n_parts = 2 if num_hw_tiles >= 2 else 1
    tiles_per_part = -(-num_hw_tiles // n_parts)

    def x_map_p1(n, p, t):
        blk = p * tiles_per_part + t
        # Clamp fully out-of-range block indices (odd tile counts); their
        # contribution is masked to zero inside the kernel.
        return (n, 0, jnp.minimum(blk, num_hw_tiles - 1))

    psum = pl.pallas_call(
        functools.partial(_pooled_sum_kernel, hw=HW, hw_tile=hw_tile,
                          tiles_per_part=tiles_per_part),
        out_shape=jax.ShapeDtypeStruct((N, n_parts, C, 1), jnp.float32),
        grid_spec=pltpu.PrefetchScalarGridSpec(
            num_scalar_prefetch=0,
            grid=(N, n_parts, tiles_per_part),
            in_specs=[pl.BlockSpec((1, C, hw_tile), x_map_p1)],
            out_specs=pl.BlockSpec((1, 1, C, 1), lambda n, p, t: (n, p, 0, 0)),
        ),
        compiler_params=pltpu.CompilerParams(
            dimension_semantics=("parallel", "parallel", "arbitrary"),
            vmem_limit_bytes=vmem_budget),
    )(x)

    # Tiny cSE MLP on the pooled (N, C) vector: negligible work, done in XLA.
    pooled = jnp.sum(psum, axis=1) * (1.0 / float(HW))            # (N, C, 1)
    h = jnp.maximum(jnp.einsum("hc,ncx->nhx", w1, pooled) + b1, 0.0)
    cse = jax.nn.sigmoid(jnp.einsum("ch,nhx->ncx", w2, h) + b2)   # (N, C, 1)

    out = pl.pallas_call(
        functools.partial(_apply_kernel, sse_on_mxu=sse_on_mxu),
        out_shape=jax.ShapeDtypeStruct((N, C, HW), out_dtype),
        grid_spec=pltpu.PrefetchScalarGridSpec(
            num_scalar_prefetch=0,
            grid=(N, num_hw_tiles),
            in_specs=[
                pl.BlockSpec((1, C, hw_tile), lambda n, k: (n, 0, k)),
                pl.BlockSpec((1, C, 1), lambda n, k: (n, 0, 0)),
                pl.BlockSpec(ws_block, lambda n, k: (0, 0)),
                bs_spec,
            ],
            out_specs=pl.BlockSpec((1, C, hw_tile), lambda n, k: (n, 0, k)),
        ),
        compiler_params=pltpu.CompilerParams(
            dimension_semantics=("parallel", "parallel"),
            vmem_limit_bytes=vmem_budget),
        input_output_aliases=alias,
    )(x, cse, ws_arg, bs)
    return out.reshape(N, C, H, W)


def scse_reference(x_nchw, w1, b1, w2, b2, ws, bs):
    """Pure-JAX reference mirroring the PyTorch module."""
    N, C, H, W = x_nchw.shape
    x = x_nchw.reshape(N, C, H * W)
    pooled = jnp.mean(x, axis=2, keepdims=True)                          # (N, C, 1)
    h = jnp.maximum(jnp.einsum("hc,ncx->nhx", w1, pooled) + b1, 0.0)     # (N, hid, 1)
    cse = jax.nn.sigmoid(jnp.einsum("ch,nhx->ncx", w2, h) + b2)          # (N, C, 1)
    sse = jax.nn.sigmoid(jnp.einsum("oc,ncx->nox", ws, x) + bs)          # (N, 1, HW)
    out = x * cse + x * sse
    return out.reshape(N, C, H, W)


if __name__ == "__main__":
    def make_case(key, n, c, h, w, reduction=16):
        hidden = max(c // reduction, 1)
        ks = jax.random.split(key, 7)
        x = jax.random.normal(ks[0], (n, c, h, w), dtype=jnp.float32)
        w1 = jax.random.normal(ks[1], (hidden, c), dtype=jnp.float32) * 0.1
        b1 = jax.random.normal(ks[2], (hidden, 1), dtype=jnp.float32) * 0.1
        w2 = jax.random.normal(ks[3], (c, hidden), dtype=jnp.float32) * 0.1
        b2 = jax.random.normal(ks[4], (c, 1), dtype=jnp.float32) * 0.1
        ws = jax.random.normal(ks[5], (1, c), dtype=jnp.float32) * 0.1
        bs = jax.random.normal(ks[6], (1, 1), dtype=jnp.float32) * 0.1
        return x, (w1, b1, w2, b2, ws, bs)

    k1, k2, k3 = jax.random.split(jax.random.PRNGKey(0), 3)

    # Case 1: fused single-pass path (slab fits VMEM), VPU sSE branch (C < 64).
    x, params = make_case(k1, 2, 32, 16, 16)
    ref = scse_reference(x, *params)
    out = jax.block_until_ready(scse_pallas(x, *params))
    assert out.shape == x.shape and out.dtype == x.dtype
    assert jnp.allclose(out, ref, atol=3e-5, rtol=3e-5), "fused path mismatch"

    # Case 2: forced two-pass tiled path, H*W = 400 (not a multiple of 128):
    # exercises the cdiv grid, masked reduction tail and the 2-way partition.
    x, params = make_case(k2, 2, 32, 20, 20)
    ref = scse_reference(x, *params)
    out = jax.block_until_ready(
        scse_pallas(x, *params, force_two_pass=True, hw_tile=128))
    assert jnp.allclose(out, ref, atol=3e-5, rtol=3e-5), "two-pass path mismatch"

    # Case 3: fused path taking the MXU branch for sSE (C >= 64).
    x, params = make_case(k3, 2, 64, 16, 16)
    ref = scse_reference(x, *params)
    out = jax.block_until_ready(scse_pallas(x, *params))
    assert jnp.allclose(out, ref, atol=3e-5, rtol=3e-5), "MXU-sSE path mismatch"

    print("KERNEL_OK")
</pallas_src>

<mosaic_0001>
module attributes {stable_mosaic.version = 11 : i64} {
  func.func @_fused_kernel(%arg0: i32, %arg1: memref<1x32x256xf32, #tpu.memory_space<vmem>>, %arg2: memref<2x32xf32, #tpu.memory_space<vmem>>, %arg3: memref<2x1xf32, #tpu.memory_space<vmem>>, %arg4: memref<32x2xf32, #tpu.memory_space<vmem>>, %arg5: memref<32x1xf32, #tpu.memory_space<vmem>>, %arg6: memref<32x1xf32, #tpu.memory_space<vmem>>, %arg7: memref<1x1xf32, #tpu.memory_space<smem>>, %arg8: memref<1x32x256xf32, #tpu.memory_space<vmem>>) attributes {dimension_semantics = [#tpu.dimension_semantics<parallel>], iteration_bounds = array<i64: 2>, scalar_prefetch = 0 : i64, scratch_operands = 0 : i64, tpu.core_type = #tpu.core_type<tc>, window_params = [{transform_indices = @transform_0, window_bounds = array<i64: 1, 32, 256>}, {pipeline_mode = #tpu.pipeline_mode<synchronous>, transform_indices = @transform_1, window_bounds = array<i64: 2, 32>}, {pipeline_mode = #tpu.pipeline_mode<synchronous>, transform_indices = @transform_2, window_bounds = array<i64: 2, 1>}, {pipeline_mode = #tpu.pipeline_mode<synchronous>, transform_indices = @transform_3, window_bounds = array<i64: 32, 2>}, {pipeline_mode = #tpu.pipeline_mode<synchronous>, transform_indices = @transform_4, window_bounds = array<i64: 32, 1>}, {pipeline_mode = #tpu.pipeline_mode<synchronous>, transform_indices = @transform_5, window_bounds = array<i64: 32, 1>}, {transform_indices = @transform_6, window_bounds = array<i64: 1, 1>}, {transform_indices = @transform_7, window_bounds = array<i64: 1, 32, 256>}]} {
    %c0 = arith.constant 0 : index
    %c0_0 = arith.constant 0 : index
    %c0_1 = arith.constant 0 : index
    %0 = vector.load %arg1[%c0, %c0_0, %c0_1] : memref<1x32x256xf32, #tpu.memory_space<vmem>>, vector<1x32x256xf32>
    %1 = vector.shape_cast %0 : vector<1x32x256xf32> to vector<32x256xf32>
    %cst = arith.constant dense<0.000000e+00> : vector<32xf32>
    %2 = vector.multi_reduction <add>, %1, %cst [1] : vector<32x256xf32> to vector<32xf32>
    %3 = vector.shape_cast %2 : vector<32xf32> to vector<32x1xf32>
    %cst_2 = arith.constant 3.906250e-03 : f32
    %4 = vector.broadcast %cst_2 : f32 to vector<32x1xf32>
    %5 = arith.mulf %3, %4 : vector<32x1xf32>
    %c0_3 = arith.constant 0 : index
    %c0_4 = arith.constant 0 : index
    %6 = vector.load %arg2[%c0_3, %c0_4] : memref<2x32xf32, #tpu.memory_space<vmem>>, vector<2x32xf32>
    %cst_5 = arith.constant dense<0.000000e+00> : vector<2x1xf32>
    %7 = tpu.matmul %6, %5, %cst_5 {dimension_numbers = #tpu.dot_dimension_numbers<[1], [0], [0], [1], [0, 0, 1, 1], [], []>} : vector<2x32xf32>, vector<32x1xf32>, vector<2x1xf32> -> vector<2x1xf32>
    %c0_6 = arith.constant 0 : index
    %c0_7 = arith.constant 0 : index
    %8 = vector.load %arg3[%c0_6, %c0_7] : memref<2x1xf32, #tpu.memory_space<vmem>>, vector<2x1xf32>
    %9 = arith.addf %7, %8 : vector<2x1xf32>
    %cst_8 = arith.constant 0.000000e+00 : f32
    %10 = vector.broadcast %cst_8 : f32 to vector<2x1xf32>
    %11 = arith.maximumf %9, %10 : vector<2x1xf32>
    %c0_9 = arith.constant 0 : index
    %c0_10 = arith.constant 0 : index
    %12 = vector.load %arg4[%c0_9, %c0_10] : memref<32x2xf32, #tpu.memory_space<vmem>>, vector<32x2xf32>
    %cst_11 = arith.constant dense<0.000000e+00> : vector<32x1xf32>
    %13 = tpu.matmul %12, %11, %cst_11 {dimension_numbers = #tpu.dot_dimension_numbers<[1], [0], [0], [1], [0, 0, 1, 1], [], []>} : vector<32x2xf32>, vector<2x1xf32>, vector<32x1xf32> -> vector<32x1xf32>
    %c0_12 = arith.constant 0 : index
    %c0_13 = arith.constant 0 : index
    %14 = vector.load %arg5[%c0_12, %c0_13] : memref<32x1xf32, #tpu.memory_space<vmem>>, vector<32x1xf32>
    %15 = arith.addf %13, %14 : vector<32x1xf32>
    %16 = arith.negf %15 : vector<32x1xf32>
    %17 = math.exp %16 : vector<32x1xf32>
    %cst_14 = arith.constant 1.000000e+00 : f32
    %18 = vector.broadcast %cst_14 : f32 to vector<32x1xf32>
    %19 = arith.addf %18, %17 : vector<32x1xf32>
    %20 = arith.divf %18, %19 : vector<32x1xf32>
    %c0_15 = arith.constant 0 : index
    %c0_16 = arith.constant 0 : index
    %21 = vector.load %arg6[%c0_15, %c0_16] : memref<32x1xf32, #tpu.memory_space<vmem>>, vector<32x1xf32>
    %22 = vector.broadcast %21 : vector<32x1xf32> to vector<32x256xf32>
    %23 = arith.mulf %22, %1 : vector<32x256xf32>
    %cst_17 = arith.constant dense<0.000000e+00> : vector<256xf32>
    %24 = vector.multi_reduction <add>, %23, %cst_17 [0] : vector<32x256xf32> to vector<256xf32>
    %25 = vector.shape_cast %24 : vector<256xf32> to vector<1x256xf32>
    %c0_18 = arith.constant 0 : index
    %c0_19 = arith.constant 0 : index
    %26 = memref.load %arg7[%c0_18, %c0_19] : memref<1x1xf32, #tpu.memory_space<smem>>
    %27 = vector.broadcast %26 : f32 to vector<1x256xf32>
    %28 = arith.addf %25, %27 : vector<1x256xf32>
    %29 = arith.negf %28 : vector<1x256xf32>
    %30 = math.exp %29 : vector<1x256xf32>
    %cst_20 = arith.constant 1.000000e+00 : f32
    %31 = vector.broadcast %cst_20 : f32 to vector<1x256xf32>
    %32 = arith.addf %31, %30 : vector<1x256xf32>
    %33 = arith.divf %31, %32 : vector<1x256xf32>
    %34 = vector.broadcast %20 : vector<32x1xf32> to vector<32x256xf32>
    %35 = vector.broadcast %33 : vector<1x256xf32> to vector<32x256xf32>
    %36 = arith.addf %34, %35 : vector<32x256xf32>
    %37 = arith.mulf %1, %36 : vector<32x256xf32>
    %c0_21 = arith.constant 0 : index
    %c0_22 = arith.constant 0 : index
    %c0_23 = arith.constant 0 : index
    %38 = vector.load %arg8[%c0_21, %c0_22, %c0_23] : memref<1x32x256xf32, #tpu.memory_space<vmem>>, vector<1x32x256xf32>
    %39 = vector.shape_cast %38 : vector<1x32x256xf32> to vector<32x256xf32>
    %40 = vector.shape_cast %37 : vector<32x256xf32> to vector<1x32x256xf32>
    tpu.vector_store %arg8[%c0_21, %c0_22, %c0_23], %40 {strides = array<i32>} : memref<1x32x256xf32, #tpu.memory_space<vmem>>, vector<1x32x256xf32>,
    return
  }
  func.func @transform_0(%arg0: i32) -> (i32, i32, i32) {
    %c0_i32 = arith.constant 0 : i32
    %c0_i32_0 = arith.constant 0 : i32
    %c0_i32_1 = arith.constant 0 : i32
    return %arg0, %c0_i32, %c0_i32_0 : i32, i32, i32
  }
  func.func @transform_1(%arg0: i32) -> (i32, i32) {
    %c0_i32 = arith.constant 0 : i32
    %c0_i32_0 = arith.constant 0 : i32
    %c0_i32_1 = arith.constant 0 : i32
    return %c0_i32, %c0_i32_0 : i32, i32
  }
  func.func @transform_2(%arg0: i32) -> (i32, i32) {
    %c0_i32 = arith.constant 0 : i32
    %c0_i32_0 = arith.constant 0 : i32
    %c0_i32_1 = arith.constant 0 : i32
    return %c0_i32, %c0_i32_0 : i32, i32
  }
  func.func @transform_3(%arg0: i32) -> (i32, i32) {
    %c0_i32 = arith.constant 0 : i32
    %c0_i32_0 = arith.constant 0 : i32
    %c0_i32_1 = arith.constant 0 : i32
    return %c0_i32, %c0_i32_0 : i32, i32
  }
  func.func @transform_4(%arg0: i32) -> (i32, i32) {
    %c0_i32 = arith.constant 0 : i32
    %c0_i32_0 = arith.constant 0 : i32
    %c0_i32_1 = arith.constant 0 : i32
    return %c0_i32, %c0_i32_0 : i32, i32
  }
  func.func @transform_5(%arg0: i32) -> (i32, i32) {
    %c0_i32 = arith.constant 0 : i32
    %c0_i32_0 = arith.constant 0 : i32
    %c0_i32_1 = arith.constant 0 : i32
    return %c0_i32, %c0_i32_0 : i32, i32
  }
  func.func @transform_6(%arg0: i32) -> (i32, i32) {
    %c0_i32 = arith.constant 0 : i32
    %c0_i32_0 = arith.constant 0 : i32
    %c0_i32_1 = arith.constant 0 : i32
    return %c0_i32, %c0_i32_0 : i32, i32
  }
  func.func @transform_7(%arg0: i32) -> (i32, i32, i32) {
    %c0_i32 = arith.constant 0 : i32
    %c0_i32_0 = arith.constant 0 : i32
    %c0_i32_1 = arith.constant 0 : i32
    return %arg0, %c0_i32, %c0_i32_0 : i32, i32, i32
  }
}

</mosaic_0001>

<bundles_post_ra>
// kernel: tpu_custom_call.1
= control target key start
LH: loop header
LB: loop body
LE: loop exit
PB: predicated region body
PF: predicated region fallthrough
CT: control target
= control target key end

     0   :  { %s1180_s0 = inlined_call_operand.hbm [shape: f32[2,32,256], index: 0, kind: input, shape index: {}, may-alias: {0,7}]   ;;  %s1181_s1 = inlined_call_operand.vmem [shape: f32[2,32], index: 1, kind: input, shape index: {}]   ;;  %s1182_s2 = inlined_call_operand.vmem [shape: f32[2,1], index: 2, kind: input, shape index: {}]   ;;  %s1183_s3 = inlined_call_operand.vmem [shape: f32[32,2], index: 3, kind: input, shape index: {}]   ;;  %s1184_s4 = inlined_call_operand.vmem [shape: f32[32,1], index: 4, kind: input, shape index: {}]   ;;  %s1185_s5 = inlined_call_operand.vmem [shape: f32[32,1], index: 5, kind: input, shape index: {}]   ;;  %s1186_s6 = inlined_call_operand.<no memory space> [shape: f32[1,1], index: 6, kind: input, shape index: {}]   ;;  %s1187_s7 = inlined_call_operand.hbm [shape: f32[2,32,256], index: 7, kind: output, shape index: {}, may-alias: {0,7}]  }
   0x1   :  { %12 = sst [smem:[#allocation2]] %s1186_s6 }
   0x2   :  { %13 = vsyncpa [#allocation4], 0 }
   0x3   :  { %15 = vsyncpa [#allocation4 + $0x1], 0 }
   0x4   :  { %16 = vsyncpa [#allocation5], 0 }
   0x5   :  { %18 = vsyncpa [#allocation5 + $0x1], 0  ;;  %s960_s26 = smov 0   ;;  %s962_s27 = smov 0  }
   0x6   :  { %s964_s28 = smov 0   ;;  %s966_s29 = smov 0  }
   0x7 LB: > { %s981_s6 = sadd.s32 4294967295, %s910_s29   ;;  %s706_s30 = sadd.s32 4294967294, %s910_s29   ;;  %s910_s29 = sphi %s966_s29, %s1197_s29   ;;  %s906_s28 = sphi %s964_s28, %s1196_s28   ;;  %s902_s27 = sphi %s962_s27, %s1195_s27   ;;  %s898_s26 = sphi %s960_s26, %s1194_s26  }
   0x8   : > { %s985_s8 = sadd.s32 1, %s910_s29   ;;  %s31_s9 = sadd.s32 1, %s906_s28 }
   0x9   : > { %s28_s10 = ssub.s32 %s910_s29, %s985_s8  ;;  %p38_p0 = scmp.ne.s32.totalorder %s906_s28, %s902_s27 }
   0xa   : > { %p29_p1 = scmp.eq.s32.totalorder %s28_s10, 0  ;;  %p39_p2 = scmp.eq.s32.totalorder %s910_s29, 0 }
   0xb   : > { %p44_p3 = scmp.ne.s32.totalorder %s902_s27, %s898_s26  ;;  %p45_p4 = scmp.eq.s32.totalorder %s981_s6, 0 }
   0xc   : > { %s997_s11 = scalar_select %p29_p1, %s906_s28, %s31_s9  }
   0xd   : > { %p999_p5 = por %p39_p2, %p38_p0  ;;  %p1003_p6 = por %p45_p4, %p44_p3 }
   0xe   : > { %p194_p7 = scmp.eq.s32.totalorder %s981_s6, 1  ;;  %p200_p8 = scmp.eq.s32.totalorder %s706_s30, 1 }
   0xf   : > { %p748_p10 = scmp.lt.s32.totalorder %s910_s29, 2  ;;  %s238_s16 = sand.u32 1, %s906_s28  }
  0x10   : > { %p1010_p11 = por %p194_p7, %p38_p0  ;;  %p1014_p12 = por %p200_p8, %p44_p3 }
  0x11   : > { %s732_s17 = sshll.u32 %s910_s29, 6  ;;  %s709_s18 = sshll.u32 %s238_s16, 6 }
  0x12   : > { %s247_s21 = scalar_lea.hbm %s1180_s0, %s732_s17  ;;  %s242_s23 = scalar_lea.vmem [#allocation3], %s709_s18 }
  0x13   : > { %s248_s22 = sshll.u32 %s247_s21, 4  ;;  %s250_s24 = sshll.u32 %s242_s23, 4  ;;  %s249_s22 = int_to_ptr.hbm [resolvable:$true] %s248_s22  ;;  %s251_s24 = int_to_ptr.vmem [resolvable:$true] %s250_s24 }
  0x14   : > { %p1025_p13 = pnand %p748_p10, %p999_p5  ;;  %p712_p0 = scmp.ge.s32.totalorder %s910_s29, 1 }
  0x15   : > { %p258_p1 = scmp.lt.s32.totalorder %s910_s29, 3  ;;  %s239_s30 = scalar_lea.sflag [#allocation4], %s238_s16 }
  0x16   : > { %s814_s9 = sshra.s32 %s249_s22, 4  ;;  %p818_p3 = pneg %p1025_p13  ;;  %s815_s9 = int_to_ptr.hbm [resolvable:$true] %s814_s9 }
  0x17   : > { %s816_s10 = scalar_lea.hbm %s815_s9, 64  ;;  %s821_s12 = scalar_lea.hbm %s1180_s0, 128 }
  0x18   : > { %p817_p2 = scmp.ne.s32.totalorder %s815_s9, %s816_s10  ;;  %p822_p5 = scmp.lt.s32.totalorder %s815_s9, %s1180_s0 }
  0x19   : > { %p823_p8 = scmp.lt.s32.totalorder %s821_s12, %s816_s10 }
  0x1a   : > { %p819_p4 = pnand %p818_p3, %p817_p2 }
  0x1b   : > { %p824_p10 = por %p823_p8, %p822_p5 }
  0x1c   : > { %p820_p7 = pneg %p819_p4 }
  0x1e   : > { %p825_p9 = pnand %p824_p10, %p820_p7 }
  0x20   : > { %828 = shalt.err (!%p825_p9)
}
  0x21   : > { %s912_s16 = smov 256   ;;  %s913_s21 = smov 16  }
  0x22   : > { %743 = dma.hbm_to_vmem [thread:$0]  (!%p1025_p13), %s249_s22, 1024, %s251_s24, %s239_s30, %s912_s16, %s912_s16, %s913_s21  }
  0x23   : > { %p259_p2 = pnand %p712_p0, %p258_p1 }
  0x24   : > { %s1046_s23 = sand.u32 (!%p259_p2), 1, %s902_s27  }
  0x25   : > { %262 = sbr.rel (%p259_p2) target bundleno = 588 (0x24c), region = 48  ;;  %s713_s9 = sshll.u32 (!%p259_p2), %s1046_s23, 6 }
  0x26   : > { %s265_s10 = scalar_lea.sflag (!%p259_p2), [#allocation4], %s1046_s23  ;;  %s268_s17 = scalar_lea.vmem (!%p259_p2), [#allocation3], %s713_s9 }
  0x2a   : > { %889 = dma.done.wait (%p1003_p6), %s265_s10, 1024  }
  0x2b   : > { %891 = vsyncadd (%p1003_p6), %s265_s10, 4294966272  ;;  %v1056_v0 = vld [vmem:[%s268_s17 + $0x30] sm:$0xff]  ;;  %v1058_v1 = vld [vmem:[%s268_s17 + $0x38] sm:$0xff]  ;;  %vm326_vm0 = vcmask 261120   ;;  %v914_v23 = vmov 0   ;;  %vm372_vm1 = vcmask 1041408  }
  0x2c   : > { %v1060_v2 = vld [vmem:[%s268_s17 + $0x10] sm:$0xff]  ;;  %v317_v3 = vadd.f32 %v1058_v1, %v1056_v0  ;;  %v1064_v4 = vld [vmem:[%s268_s17 + $0x18] sm:$0xff]  ;;  %v1068_v6 = vld [vmem:[%s268_s17 + $0x20] sm:$0xff]  ;;  %788 = vset.pattern.permute.xlu0 %v914_v23  ;;  %789 = vset.pattern.permute.xlu1 %v914_v23  ;;  %vm359_vm2 = vcmask 15360   ;;  %s531_s24 = sld [smem:[#allocation2]]  ;;  %s299_s25 = scalar_lea.vmem [#allocation6], %s713_s9 }
  0x2d   : > { %v311_v5 = vadd.f32 %v1064_v4, %v1060_v2  ;;  %v1070_v7 = vld [vmem:[%s268_s17 + $0x28] sm:$0xff]  ;;  %v1072_v8 = vld [vmem:[%s268_s17] sm:$0xff]  ;;  %v483_v21 = vld [vmem:[%s1185_s5 + $0x10] sm:$0xff]  ;;  %787 = vset.pattern.permute.xlu2 %v914_v23  ;;  %s733_s30 = sshll.u32 %s981_s6, 6  ;;  %s630_s19 = sshll.u32 %s299_s25, 4  ;;  %s631_s19 = int_to_ptr.vmem [resolvable:$true] %s630_s19 }
  0x2e   : > { %318 = vadd.xlane.f32.xlu0 %v317_v3  ;;  %v1074_v9 = vld [vmem:[%s268_s17 + $0x8] sm:$0xff]  ;;  %v314_v10 = vadd.f32 %v1070_v7, %v1068_v6  ;;  %v324_v20 = vld [vmem:[%s1181_s1] sm:$0x3]  ;;  %v484_v22 = vld [vmem:[%s1185_s5 + $0x18] sm:$0xff]  ;;  %s629_s12 = scalar_lea.hbm %s1187_s7, %s733_s30  ;;  %s618_s6 = scalar_lea.sflag [#allocation5], %s1046_s23 }
  0x2f   : > { %312 = vadd.xlane.f32.xlu1 %v311_v5  ;;  %v308_v11 = vadd.f32 %v1074_v9, %v1072_v8  ;;  %v481_v24 = vld [vmem:[%s1185_s5] sm:$0xff]  ;;  %v482_v25 = vld [vmem:[%s1185_s5 + $0x8] sm:$0xff]  ;;  %v354_v32 = vld [vmem:[%s1183_s3 + $0x18] sm:$0xff]  ;;  %s632_s20 = sshll.u32 %s629_s12, 4  ;;  %s864_s13 = scalar_lea.hbm %s1187_s7, 128  ;;  %s633_s20 = int_to_ptr.hbm [resolvable:$true] %s632_s20 }
  0x30   : > { %487 = vperm.xlu2 %787, %v481_v24   ;;  %v325_v26 = vld [vmem:[%s1182_s2] sm:$0x3]  ;;  %v352_v31 = vld [vmem:[%s1183_s3 + $0x8] sm:$0xff]  ;;  %v353_v33 = vld [vmem:[%s1183_s3 + $0x10] sm:$0xff]  ;;  %s858_s16 = sshra.s32 %s633_s20, 4  ;;  %s859_s16 = int_to_ptr.hbm [resolvable:$true] %s858_s16 }
  0x31   : > { %v351_v30 = vld [vmem:[%s1183_s3] sm:$0xff]  ;;  %v356_v38 = vld [vmem:[%s1184_s4 + $0x8] sm:$0xff]  ;;  %v358_v39 = vld [vmem:[%s1184_s4 + $0x18] sm:$0xff]  ;;  %s860_s21 = scalar_lea.hbm %s859_s16, 64  ;;  %p865_p0 = scmp.lt.s32.totalorder %s859_s16, %s1187_s7 }
  0x32   : > { %v355_v34 = vld [vmem:[%s1184_s4] sm:$0xff]  ;;  %v357_v48 = vld [vmem:[%s1184_s4 + $0x10] sm:$0xff]  ;;  %p861_p6 = scmp.ne.s32.totalorder %s859_s16, %s860_s21  ;;  %p866_p1 = scmp.lt.s32.totalorder %s864_s13, %s860_s21 }
  0x34   : > { %p862_p9 = pnand %p861_p6, %p1010_p11  ;;  %p867_p3 = por %p866_p1, %p865_p0 }
  0x36   : > { %315 = vadd.xlane.f32.xlu0 %v314_v10  ;;  %p863_p13 = pneg %p862_p9 }
  0x37   : > { %309 = vadd.xlane.f32.xlu1 %v308_v11 }
  0x38   : > { %492 = vperm.xlu2 %787, %v482_v25   ;;  %p868_p4 = pnand %p867_p3, %p863_p13 }
  0x4a   : > { %497 = vperm.xlu0 %788, %v483_v21  }
  0x50   : > { %502 = vperm.xlu1 %789, %v484_v22  }
  0x8a   : > { %v488_v59 = vpop.permute.xlu2 %487 }
  0x8b   : > { %v506_v21 = vmul.f32 %v488_v59, %v1074_v9 }
  0xa1   : > { %v319_v12 = vpop.xlane.xlu0 %318 }
  0xa2   : > { %v323_v13 = vmul.f32 0.00390625, %v319_v12  ;;  %v313_v14 = vpop.xlane.xlu1 %312 }
  0xa3   : > { %v321_v18 = vmul.f32 0.00390625, %v313_v14 }
  0xa4   : > { %342 = vmatpush.msra.mxu0 %v323_v13 }
  0xa9   : > { %v316_v15 = vpop.xlane.xlu0 %315 }
  0xaa   : > { %v322_v16 = vmul.f32 0.00390625, %v316_v15  ;;  %v310_v17 = vpop.xlane.xlu1 %309 }
  0xab   : > { %v320_v19 = vmul.f32 0.00390625, %v310_v17  ;;  %v505_v17 = vmul.f32 %v488_v59, %v1072_v8 }
  0xac   : > { %343 = vmatpush.msra.mxu0 %v322_v16 }
  0xae   : > { %344 = vmatpush.msra.mxu0 %v321_v18  ;;  %v493_v18 = vpop.permute.xlu2 %492 }
  0xaf   : > { %v507_v22 = vmul.f32 %v493_v18, %v1060_v2  ;;  %v508_v25 = vmul.f32 %v493_v18, %v1064_v4 }
  0xb0   : > { %345 = vmatpush.msra.mxu0 %v320_v19 }
  0xb1   : > { %715 = vmatmul.msk.f32.vlgmr.msra.gmra.mxu0 %vm326_vm0, %v324_v20 }
  0xbc   : > { %v498_v23 = vpop.permute.xlu0 %497 }
 0x12e   : > { %v347_v27 = vpop.f32.mrf.mxu0 }
 0x12f   : > { %v348_v28 = vadd.f32 %v347_v27, %v325_v26 }
 0x131   : > { %v350_v29 = vmax.f32 %v348_v28, 0.0 }
 0x133   : > { %716 = vmatpush.msk.msra.mxu1 %vm372_vm1, %v350_v29  ;;  %734 = vmatpush.msk.msra.mxu2 %vm372_vm1, %v350_v29 }
 0x134   : > { %735 = vmatpush.msk.msra.mxu3 %vm372_vm1, %v350_v29  ;;  %717 = vmatmul.msk.f32.vlgmr.msra.gmra.mxu1 %vm359_vm2, %v351_v30  ;;  %v513_v30 = vadd.f32 %v507_v22, %v505_v17 }
 0x135   : > { %718 = vmatmul.msk.f32.vlgmr.msra.gmra.mxu2 %vm359_vm2, %v352_v31  ;;  %720 = vmatmul.msk.f32.vlgmr.msra.gmra.mxu3 %vm359_vm2, %v354_v32  ;;  %v509_v31 = vmul.f32 %v498_v23, %v1068_v6 }
 0x13d   : > { %719 = vmatmul.msk.f32.gmra.mxu2 %vm359_vm2, %v353_v33 }
 0x1b1   : > { %v393_v35 = vpop.f32.mrf.mxu1 }
 0x1b2   : > { %v394_v36 = vadd.f32 %v393_v35, %v355_v34  ;;  %v522_v34 = vadd.f32 %v508_v25, %v506_v21  ;;  %v510_v35 = vmul.f32 %v498_v23, %v1070_v7 }
 0x1b4   : > { %v721_v37 = vmul.f32 -1.442695, %v394_v36  ;;  %v503_v36 = vpop.permute.xlu1 %502 }
 0x1b6   : > { %790 = vpow2.f32 %v721_v37 }
 0x1b8   : > { %v396_v40 = vpop.f32.mrf.mxu2  ;;  %v402_v41 = vpop.f32.mrf.mxu3 }
 0x1b9   : > { %v397_v42 = vadd.f32 %v396_v40, %v356_v38  ;;  %v403_v43 = vadd.f32 %v402_v41, %v358_v39  ;;  %v514_v40 = vadd.f32 %v513_v30, %v509_v31  ;;  %v511_v41 = vmul.f32 %v503_v36, %v1056_v0 }
 0x1bb   : > { %v722_v44 = vmul.f32 -1.442695, %v397_v42  ;;  %v724_v45 = vmul.f32 -1.442695, %v403_v43  ;;  %v512_v42 = vmul.f32 %v503_v36, %v1058_v1 }
 0x1bc   : > { %v791_v46 = vpop.eup %790 }
 0x1bd   : > { %v417_v47 = vadd.f32 1.0, %v791_v46  ;;  %792 = vpow2.f32 %v722_v44 }
 0x1be   : > { %794 = vpow2.f32 %v724_v45  ;;  %v523_v45 = vadd.f32 %v522_v34, %v510_v35 }
 0x1bf   : > { %796 = vrcp.f32 %v417_v47  ;;  %v432_v60 = vand.u32 2147483648, %v417_v47  ;;  %v430_v62 = vand.u32 2147483647, %v417_v47  ;;  %vm426_vm4 = vweird.f32 %v417_v47 }
 0x1c0   : > { %v399_v49 = vpop.f32.mrf.mxu2 }
 0x1c1   : > { %v400_v50 = vadd.f32 %v399_v49, %v357_v48  ;;  %v433_v11 = vor.u32 1.1754944e-38, %v432_v60  ;;  %vm431_vm6 = vcmp.eq.f32.partialorder %v430_v62, 8.507059e+37  ;;  %v515_v49 = vadd.f32 %v514_v40, %v511_v41 }
 0x1c3   : > { %v793_v51 = vpop.eup %792  ;;  %v723_v52 = vmul.f32 -1.442695, %v400_v50 }
 0x1c4   : > { %v795_v53 = vpop.eup %794  ;;  %v418_v54 = vadd.f32 1.0, %v793_v51 }
 0x1c5   : > { %v797_v55 = vpop.eup %796  ;;  %798 = vpow2.f32 %v723_v52  ;;  %v1122_v57 = vadd.f32 1.0, %v795_v53  ;;  %v524_v52 = vadd.f32 %v523_v45, %v512_v42 }
 0x1c6   : > { %800 = vrcp.f32 %v418_v54  ;;  %v422_v56 = vmul.f32 %v797_v55, %v417_v47  ;;  %vm427_vm3 = vweird.f32 %v797_v55  ;;  %v447_v16 = vand.u32 2147483648, %v418_v54 }
 0x1c7   : > { %802 = vrcp.f32 %v1122_v57  ;;  %vm428_vm5 = vmor %vm426_vm4, %vm427_vm3  ;;  %v445_v24 = vand.u32 2147483647, %v418_v54  ;;  %vm441_vm8 = vweird.f32 %v418_v54  ;;  %vm471_vm15 = vweird.f32 %v1122_v57 }
 0x1c8   : > { %v423_v58 = vsub.f32 1.0, %v422_v56  ;;  %v448_v28 = vor.u32 1.1754944e-38, %v447_v16  ;;  %v475_v56 = vand.u32 2147483647, %v1122_v57  ;;  %v525_v59 = vrot.slane %v524_v52, 4 }
 0x1c9   : > { %vm446_vm10 = vcmp.eq.f32.partialorder %v445_v24, 8.507059e+37  ;;  %v532_v16 = vstv %s531_s24 }
 0x1ca   : > { %v424_v61 = vmul.f32 %v797_v55, %v423_v58  ;;  %v516_v58 = vrot.slane %v515_v49, 4  ;;  %vm476_vm2 = vcmp.eq.f32.partialorder %v475_v56, 8.507059e+37 }
 0x1cb   : > { %v799_v63 = vpop.eup %798 }
 0x1cc   : > { %v801_v3 = vpop.eup %800  ;;  %v419_v5 = vadd.f32 1.0, %v799_v63  ;;  %v425_v10 = vadd.f32 %v797_v55, %v424_v61  ;;  %v517_v62 = vadd.f32 %v516_v58, %v515_v49  ;;  %v526_v63 = vadd.f32 %v525_v59, %v524_v52 }
 0x1cd   : > { %v437_v12 = vmul.f32 %v801_v3, %v418_v54  ;;  %v803_v19 = vpop.eup %802  ;;  %vm442_vm7 = vweird.f32 %v801_v3  ;;  %v477_v54 = vand.u32 2147483648, %v1122_v57 }
 0x1ce   : > { %804 = vrcp.f32 %v419_v5  ;;  %v429_v13 = vsel %vm428_vm5, %v797_v55, %v425_v10  ;;  %vm443_vm9 = vmor %vm441_vm8, %vm442_vm7  ;;  %v467_v29 = vmul.f32 %v803_v19, %v1122_v57  ;;  %v462_v44 = vand.u32 2147483648, %v419_v5 }
 0x1cf   : > { %v434_v14 = vsel %vm431_vm6, %v433_v11, %v429_v13  ;;  %v438_v15 = vsub.f32 1.0, %v437_v12  ;;  %v460_v46 = vand.u32 2147483647, %v419_v5  ;;  %vm456_vm12 = vweird.f32 %v419_v5 }
 0x1d0   : > { %575 = vperm.xlu2 %787, %v434_v14   ;;  %v468_v39 = vsub.f32 1.0, %v467_v29  ;;  %v463_v51 = vor.u32 1.1754944e-38, %v462_v44  ;;  %vm472_vm0 = vweird.f32 %v803_v19  ;;  %v478_v60 = vor.u32 1.1754944e-38, %v477_v54 }
 0x1d1   : > { %v439_v20 = vmul.f32 %v801_v3, %v438_v15  ;;  %vm461_vm14 = vcmp.eq.f32.partialorder %v460_v46, 8.507059e+37  ;;  %vm473_vm1 = vmor %vm471_vm15, %vm472_vm0  ;;  %v527_v10 = vrot.slane %v526_v63, 2 }
 0x1d2   : > { %v469_v48 = vmul.f32 %v803_v19, %v468_v39 }
 0x1d3   : > { %v440_v26 = vadd.f32 %v801_v3, %v439_v20  ;;  %v528_v12 = vadd.f32 %v527_v10, %v526_v63 }
 0x1d4   : > { %v805_v27 = vpop.eup %804  ;;  %v470_v55 = vadd.f32 %v803_v19, %v469_v48 }
 0x1d5   : > { %v444_v32 = vsel %vm443_vm9, %v801_v3, %v440_v26  ;;  %v452_v33 = vmul.f32 %v805_v27, %v419_v5  ;;  %vm457_vm11 = vweird.f32 %v805_v27  ;;  %v518_v5 = vrot.slane %v517_v62, 2 }
 0x1d6   : > { %v449_v37 = vsel %vm446_vm10, %v448_v28, %v444_v32  ;;  %vm458_vm13 = vmor %vm456_vm12, %vm457_vm11  ;;  %v474_v61 = vsel %vm473_vm1, %v803_v19, %v470_v55  ;;  %v529_v14 = vrot.slane %v528_v12, 1 }
 0x1d7   : > { %v453_v38 = vsub.f32 1.0, %v452_v33  ;;  %v479_v3 = vsel %vm476_vm2, %v478_v60, %v474_v61  ;;  %v519_v11 = vadd.f32 %v518_v5, %v517_v62 }
 0x1d8   : > { %580 = vperm.xlu2 %787, %v449_v37   ;;  %v530_v57 = vadd.f32 %v529_v14, %v528_v12 }
 0x1d9   : > { %v454_v43 = vmul.f32 %v805_v27, %v453_v38  ;;  %v520_v13 = vrot.slane %v519_v11, 1 }
 0x1da   : > { %v534_v18 = vadd.f32 %v532_v16, %v530_v57 }
 0x1db   : > { %v455_v47 = vadd.f32 %v805_v27, %v454_v43  ;;  %v521_v15 = vadd.f32 %v520_v13, %v519_v11 }
 0x1dc   : > { %v726_v21 = vmul.f32 -1.442695, %v534_v18 }
 0x1dd   : > { %v459_v50 = vsel %vm458_vm13, %v805_v27, %v455_v47  ;;  %v533_v17 = vadd.f32 %v532_v16, %v521_v15 }
 0x1de   : > { %v464_v53 = vsel %vm461_vm14, %v463_v51, %v459_v50 }
 0x1df   : > { %v725_v20 = vmul.f32 -1.442695, %v533_v17 }
 0x1e0   : > { %585 = vperm.xlu2 %787, %v464_v53  }
 0x1e1   : > { %806 = vpow2.f32 %v725_v20 }
 0x1e2   : > { %808 = vpow2.f32 %v726_v21 }
 0x1e7   : > { %v807_v19 = vpop.eup %806 }
 0x1e8   : > { %590 = vperm.xlu2 %787, %v479_v3   ;;  %v809_v22 = vpop.eup %808  ;;  %v541_v23 = vadd.f32 1.0, %v807_v19 }
 0x1e9   : > { %v542_v24 = vadd.f32 1.0, %v809_v22 }
 0x1ea   : > { %810 = vrcp.f32 %v541_v23  ;;  %vm548_vm3 = vweird.f32 %v541_v23  ;;  %v554_v33 = vand.u32 2147483648, %v541_v23  ;;  %v552_v36 = vand.u32 2147483647, %v541_v23 }
 0x1eb   : > { %812 = vrcp.f32 %v542_v24  ;;  %vm563_vm5 = vweird.f32 %v542_v24  ;;  %v569_v34 = vand.u32 2147483648, %v542_v24  ;;  %v567_v38 = vand.u32 2147483647, %v542_v24 }
 0x1ec   : > { %v555_v39 = vor.u32 1.1754944e-38, %v554_v33  ;;  %vm553_vm9 = vcmp.eq.f32.partialorder %v552_v36, 8.507059e+37 }
 0x1ed   : > { %v570_v40 = vor.u32 1.1754944e-38, %v569_v34  ;;  %vm568_vm10 = vcmp.eq.f32.partialorder %v567_v38, 8.507059e+37 }
 0x1f0   : > { %v811_v25 = vpop.eup %810 }
 0x1f1   : > { %v813_v26 = vpop.eup %812  ;;  %v544_v27 = vmul.f32 %v811_v25, %v541_v23  ;;  %vm549_vm4 = vweird.f32 %v811_v25 }
 0x1f2   : > { %v559_v28 = vmul.f32 %v813_v26, %v542_v24  ;;  %vm564_vm6 = vweird.f32 %v813_v26  ;;  %vm550_vm7 = vmor %vm548_vm3, %vm549_vm4 }
 0x1f3   : > { %v545_v29 = vsub.f32 1.0, %v544_v27  ;;  %vm565_vm8 = vmor %vm563_vm5, %vm564_vm6 }
 0x1f4   : > { %v560_v30 = vsub.f32 1.0, %v559_v28 }
 0x1f5   : > { %v546_v31 = vmul.f32 %v811_v25, %v545_v29 }
 0x1f6   : > { %v561_v32 = vmul.f32 %v813_v26, %v560_v30 }
 0x1f7   : > { %v547_v35 = vadd.f32 %v811_v25, %v546_v31 }
 0x1f8   : > { %v562_v37 = vadd.f32 %v813_v26, %v561_v32 }
 0x1f9   : > { %v551_v41 = vsel %vm550_vm7, %v811_v25, %v547_v35 }
 0x1fa   : > { %v566_v42 = vsel %vm565_vm8, %v813_v26, %v562_v37  ;;  %v556_v44 = vsel %vm553_vm9, %v555_v39, %v551_v41 }
 0x1fb   : > { %v571_v45 = vsel %vm568_vm10, %v570_v40, %v566_v42 }
 0x22a   : > { %v576_v43 = vpop.permute.xlu2 %575 }
 0x22b   : > { %v593_v46 = vadd.f32 %v576_v43, %v556_v44  ;;  %v594_v47 = vadd.f32 %v576_v43, %v571_v45 }
 0x22d   : > { %v601_v48 = vmul.f32 %v593_v46, %v1072_v8  ;;  %v602_v49 = vmul.f32 %v594_v47, %v1074_v9 }
 0x22f   : > { %609 = vst [vmem:[%s299_s25] sm:$0xff] %v601_v48 }
 0x230   : > { %610 = vst [vmem:[%s299_s25 + $0x8] sm:$0xff] %v602_v49 }
 0x232   : > { %v581_v50 = vpop.permute.xlu2 %580 }
 0x233   : > { %v595_v51 = vadd.f32 %v581_v50, %v556_v44  ;;  %v596_v52 = vadd.f32 %v581_v50, %v571_v45 }
 0x235   : > { %v603_v53 = vmul.f32 %v595_v51, %v1060_v2  ;;  %v604_v54 = vmul.f32 %v596_v52, %v1064_v4 }
 0x237   : > { %611 = vst [vmem:[%s299_s25 + $0x10] sm:$0xff] %v603_v53 }
 0x238   : > { %612 = vst [vmem:[%s299_s25 + $0x18] sm:$0xff] %v604_v54 }
 0x23a   : > { %v586_v55 = vpop.permute.xlu2 %585 }
 0x23b   : > { %v597_v56 = vadd.f32 %v586_v55, %v556_v44  ;;  %v598_v58 = vadd.f32 %v586_v55, %v571_v45 }
 0x23d   : > { %v605_v8 = vmul.f32 %v597_v56, %v1068_v6  ;;  %v606_v9 = vmul.f32 %v598_v58, %v1070_v7 }
 0x23f   : > { %613 = vst [vmem:[%s299_s25 + $0x20] sm:$0xff] %v605_v8 }
 0x240   : > { %614 = vst [vmem:[%s299_s25 + $0x28] sm:$0xff] %v606_v9 }
 0x242   : > { %v591_v2 = vpop.permute.xlu2 %590 }
 0x243   : > { %v599_v4 = vadd.f32 %v591_v2, %v556_v44  ;;  %v600_v59 = vadd.f32 %v591_v2, %v571_v45 }
 0x245   : > { %v607_v60 = vmul.f32 %v599_v4, %v1056_v0  ;;  %v608_v61 = vmul.f32 %v600_v59, %v1058_v1 }
 0x247   : > { %615 = vst [vmem:[%s299_s25 + $0x30] sm:$0xff] %v607_v60 }
 0x248   : > { %616 = vst [vmem:[%s299_s25 + $0x38] sm:$0xff] %v608_v61 }
 0x249   : > { %871 = shalt.err (!%p868_p4)
}
 0x24a   : > { %s915_s23 = smov 256   ;;  %s916_s25 = smov 16  }
 0x24b   : > { %738 = dma.vmem_to_hbm [thread:$0]  (%p1010_p11), %s631_s19, 1024, %s633_s20, %s618_s6, %s915_s23, %s915_s23, %s916_s25  }
 0x24c PF: > { %s647_s30 = sand.u32 1, %s898_s26   ;;  %p1193_p7 = scmp.ge.s32.totalorder %s910_s29, 2 }
 0x24d   : > { %s648_s9 = scalar_lea.sflag [#allocation5], %s647_s30 }
 0x24e   : > { %p745_p5 = pnand %p1193_p7, %p1014_p12 }
 0x250   : > { %p746_p8 = pneg %p745_p5 }
 0x252   : > { %893 = dma.done.wait (%p746_p8), %s648_s9, 1024  }
 0x253   : > { %895 = vsyncadd (%p746_p8), %s648_s9, 4294966272  ;;  %p21_p10 = scmp.ge.s32.totalorder %s985_s8, 4   ;;  %s1194_s26 = smov %s902_s27 }
 0x254   : > { %s1195_s27 = smov %s906_s28  ;;  %s1196_s28 = smov %s997_s11 }
 0x255   : > { %s1197_s29 = smov %s985_s8  ;;  %23 = sbr.rel (!%p21_p10) target bundleno = 7 (0x7), region = 93 }
 0x25a   :  { %654 = vsyncpa [#allocation4], 1 }
 0x25b   :  { %656 = vsyncpa [#allocation4 + $0x1], 1 }
 0x25c   :  { %657 = vsyncpa [#allocation5], 1 }
 0x25d   :  { %659 = vsyncpa [#allocation5 + $0x1], 1 }

</bundles_post_ra>
